<compile_context>
chip_gen: v5e
topology: v5e:2x2
jax: 0.10.0
libtpu: 0.0.40
codegen_flags: <defaults>
</compile_context>

<pallas_src>
import functools

import jax
import jax.numpy as jnp
from jax.experimental import pallas as pl
from jax.experimental.pallas import tpu as pltpu


def _make_kernel(vocab_size, n_rows, tile_n):
    """Kernel body closed over static, shape-derived config only."""

    def kernel(pad_ref, logits_ref, labels_ref, out_ref):
        i = pl.program_id(0)

        logits = logits_ref[...]                     # (TN, V) native dtype (e.g. bf16)
        labels = labels_ref[...]                     # (TN, 1) int32
        tn, v = logits.shape

        # First-occurrence argmax over vocab (matches torch.argmax / jnp.argmax).
        # Max + equality run in the native logits dtype; only the index
        # select/min chain is 32-bit.
        row_max = jnp.max(logits, axis=-1, keepdims=True)                 # (TN, 1)
        col_idx = jax.lax.broadcasted_iota(jnp.int32, (tn, v), 1)          # (TN, V)
        pred = jnp.min(
            jnp.where(logits == row_max, col_idx, jnp.int32(vocab_size)),
            axis=-1, keepdims=True)                                        # (TN, 1)
        # TODO(synk): if v7x bundle dumps show the 32-bit select/min pass is the
        # binding VALU slot, switch to a packed (sortable_val<<16 | ~index)
        # uint32 single-pass max to halve the 32-bit elementwise work.

        # Mask rows that fall past the true N (partial last tile reads padding).
        local_row = jax.lax.broadcasted_iota(jnp.int32, (tn, 1), 0)        # (TN, 1)
        in_range = (i * tile_n + local_row) < jnp.int32(n_rows)            # (TN, 1) bool

        pad = pad_ref[0]                                                    # SMEM scalar
        tp_cnt = jnp.sum((in_range & (pred == labels)).astype(jnp.int32),
                         keepdims=True)                                     # (1, 1)
        valid_cnt = jnp.sum((in_range & (labels != pad)).astype(jnp.int32),
                            keepdims=True)                                  # (1, 1)

        # Lane-dense per-block partial counts: lane 0 = tp, lane 1 = valid_len.
        lane = jax.lax.broadcasted_iota(jnp.int32, (8, 128), 1)
        out_ref[...] = (jnp.where(lane == 0, tp_cnt, 0)
                        + jnp.where(lane == 1, valid_cnt, 0))

    return kernel


def _vmem_config(vmem_limit_bytes):
    """(tile working-set budget, vmem_limit_bytes) — generation-aware."""
    if vmem_limit_bytes is not None:
        return int(vmem_limit_bytes) * 5 // 6, int(vmem_limit_bytes)
    try:
        cap = int(pltpu.get_tpu_info().vmem_capacity_bytes)
    except Exception:  # pragma: no cover - query unavailable
        cap = None
    if cap is not None and cap >= 100 * 1024 * 1024:
        # v5e / v6e: 128 MiB physical VMEM -> use most of it for the stream.
        return 88 * 1024 * 1024, 104 * 1024 * 1024
    # v7x (64 MiB physical) or unknown generation: stay conservative.
    return 40 * 1024 * 1024, 48 * 1024 * 1024


def _choose_tile_n(n_rows, vocab, itemsize, budget_bytes):
    """Largest multiple-of-8 row tile whose per-step working set fits the budget.

    Resident per row: double-buffered logits tile (2*itemsize B/elem) plus ~one
    int32 intermediate of the index-select pass (Mosaic streams most of the
    elementwise temporaries through vregs, so 4 B/elem is headroom, not 8),
    plus the (tiny) double-buffered int32 labels column.
    """
    per_row_bytes = vocab * (2 * itemsize + 4) + 2 * 4
    tile_n = int(budget_bytes // max(1, per_row_bytes))
    tile_n = max(8, min(1024, tile_n))
    tile_n -= tile_n % 8
    n_pad8 = ((n_rows + 7) // 8) * 8
    return max(8, min(tile_n, n_pad8))


@functools.partial(jax.jit, static_argnames=("tile_n", "vmem_limit_bytes"))
def accuracy_metric(logits, labels, pad_token_id, *, tile_n=None,
                    vmem_limit_bytes=None):
    """logits: (B, S, V) any float dtype; labels: (B, S) int; pad_token_id: int.

    Returns a scalar float32 accuracy (tp / valid_len).
    """
    b, s, v = logits.shape
    n = b * s

    # Keep the native logits dtype: this kernel is HBM-bandwidth bound, so a
    # wrapper-side f32 upcast would add a copy pass and double read traffic.
    logits2d = logits.reshape(n, v)
    labels2d = labels.reshape(n, 1).astype(jnp.int32)
    pad_arr = jnp.asarray(pad_token_id, dtype=jnp.int32).reshape(1)

    budget_bytes, vmem_limit = _vmem_config(vmem_limit_bytes)
    if tile_n is None:
        tile_n = _choose_tile_n(n, v, jnp.dtype(logits2d.dtype).itemsize,
                                budget_bytes)
    assert tile_n % 8 == 0, "tile_n must be a multiple of 8 (sublane tiling)"

    num_blocks = pl.cdiv(n, tile_n)
    grid = (num_blocks,)

    partial = pl.pallas_call(
        _make_kernel(v, n, tile_n),
        out_shape=jax.ShapeDtypeStruct((num_blocks, 8, 128), jnp.int32),
        grid_spec=pltpu.PrefetchScalarGridSpec(
            num_scalar_prefetch=1,               # pad_token_id lives in SMEM
            grid=grid,
            in_specs=[
                pl.BlockSpec((tile_n, v), lambda i, pad: (i, 0)),
                pl.BlockSpec((tile_n, 1), lambda i, pad: (i, 0)),
            ],
            # One independent lane-dense (8,128) slab per grid step -> no carried
            # state, unmasked stores, and the row axis can be core-parallel.
            out_specs=pl.BlockSpec((None, 8, 128), lambda i, pad: (i, 0, 0)),
        ),
        compiler_params=pltpu.CompilerParams(
            dimension_semantics=("parallel",),    # shard rows across TCs on v7x
            vmem_limit_bytes=vmem_limit,
        ),
    )(pad_arr, logits2d, labels2d)

    # Tiny final reduction + true division in plain XLA.
    tp = jnp.sum(partial[:, 0, 0]).astype(jnp.float32)
    valid_len = jnp.sum(partial[:, 0, 1]).astype(jnp.float32)
    return tp / valid_len


if __name__ == "__main__":
    # Small shapes implied by the forward: logits (B, S, V), labels (B, S).
    B, S, V = 2, 8, 32
    PAD_TOKEN_ID = 0

    key = jax.random.PRNGKey(0)
    k_logits, k_labels = jax.random.split(key)
    # Native bf16 logits: exercises the no-upcast (half-HBM-traffic) path.
    logits = jax.random.normal(k_logits, (B, S, V), dtype=jnp.float32).astype(jnp.bfloat16)
    labels = jax.random.randint(k_labels, (B, S), 0, V, dtype=jnp.int32)
    # Force a few pad positions so valid_len < B*S.
    labels = labels.at[0, :3].set(PAD_TOKEN_ID)

    acc = accuracy_metric(logits, labels, PAD_TOKEN_ID)
    acc = jax.block_until_ready(acc)

    # Pure-JAX reference (mirrors the PyTorch forward exactly).
    tp_ref = jnp.sum(jnp.argmax(logits, axis=-1) == labels)
    valid_ref = jnp.sum(labels != PAD_TOKEN_ID)
    ref = tp_ref.astype(jnp.float32) / valid_ref.astype(jnp.float32)

    assert jnp.allclose(acc, ref, atol=1e-6), (acc, ref)
    print("KERNEL_OK")
</pallas_src>

<mosaic_0001>
module attributes {stable_mosaic.version = 11 : i64} {
  func.func @kernel(%arg0: i32, %arg1: memref<1xi32, #tpu.memory_space<smem>>, %arg2: memref<16x32xbf16, #tpu.memory_space<vmem>>, %arg3: memref<16x1xi32, #tpu.memory_space<vmem>>, %arg4: memref<1x8x128xi32, #tpu.memory_space<vmem>>) attributes {dimension_semantics = [#tpu.dimension_semantics<parallel>], iteration_bounds = array<i64: 1>, scalar_prefetch = 1 : i64, scratch_operands = 0 : i64, tpu.core_type = #tpu.core_type<tc>, window_params = [{transform_indices = @transform_0, window_bounds = array<i64: 16, 32>}, {transform_indices = @transform_1, window_bounds = array<i64: 16, 1>}, {transform_indices = @transform_2, window_bounds = array<i64: 1, 8, 128>}]} {
    %c0 = arith.constant 0 : index
    %c0_0 = arith.constant 0 : index
    %0 = vector.load %arg2[%c0, %c0_0] : memref<16x32xbf16, #tpu.memory_space<vmem>>, vector<16x32xbf16>
    %c0_1 = arith.constant 0 : index
    %c0_2 = arith.constant 0 : index
    %1 = vector.load %arg3[%c0_1, %c0_2] : memref<16x1xi32, #tpu.memory_space<vmem>>, vector<16x1xi32>
    %cst = arith.constant dense<0xFF80> : vector<16xbf16>
    %2 = vector.multi_reduction <maximumf>, %0, %cst [1] : vector<16x32xbf16> to vector<16xbf16>
    %3 = vector.shape_cast %2 : vector<16xbf16> to vector<16x1xbf16>
    %4 = tpu.iota {dimensions = array<i32: 1>} : vector<16x32xi32>
    %5 = vector.broadcast %3 : vector<16x1xbf16> to vector<16x32xbf16>
    %6 = arith.cmpf oeq, %0, %5 : vector<16x32xbf16>
    %c32_i32 = arith.constant 32 : i32
    %7 = vector.broadcast %c32_i32 : i32 to vector<16x32xi32>
    %8 = arith.select %6, %4, %7 : vector<16x32xi1>, vector<16x32xi32>
    %cst_3 = arith.constant dense<2147483647> : vector<16xi32>
    %9 = vector.multi_reduction <minsi>, %8, %cst_3 [1] : vector<16x32xi32> to vector<16xi32>
    %10 = vector.shape_cast %9 : vector<16xi32> to vector<16x1xi32>
    %11 = tpu.iota {dimensions = array<i32: 0>} : vector<16x1xi32>
    %c16_i32 = arith.constant 16 : i32
    %12 = arith.muli %arg0, %c16_i32 : i32
    %13 = vector.broadcast %12 : i32 to vector<16x1xi32>
    %14 = arith.addi %13, %11 : vector<16x1xi32>
    %c16_i32_4 = arith.constant 16 : i32
    %15 = vector.broadcast %c16_i32_4 : i32 to vector<16x1xi32>
    %16 = arith.cmpi slt, %14, %15 : vector<16x1xi32>
    %c0_5 = arith.constant 0 : index
    %17 = memref.load %arg1[%c0_5] : memref<1xi32, #tpu.memory_space<smem>>
    %18 = arith.cmpi eq, %10, %1 : vector<16x1xi32>
    %19 = arith.andi %16, %18 : vector<16x1xi1>
    %20 = arith.extui %19 : vector<16x1xi1> to vector<16x1xi32>
    %21 = vector.shape_cast %20 : vector<16x1xi32> to vector<1x16x1xi32>
    %cst_6 = arith.constant dense<0> : vector<1xi32>
    %22 = vector.multi_reduction <add>, %21, %cst_6 [1, 2] : vector<1x16x1xi32> to vector<1xi32>
    %23 = vector.shape_cast %22 : vector<1xi32> to vector<1x1x1xi32>
    %24 = vector.extract %23[0, 0, 0] : i32 from vector<1x1x1xi32>
    %25 = vector.broadcast %24 : i32 to vector<1x1xi32>
    %26 = vector.broadcast %17 : i32 to vector<16x1xi32>
    %27 = arith.cmpi ne, %1, %26 : vector<16x1xi32>
    %28 = arith.andi %16, %27 : vector<16x1xi1>
    %29 = arith.extui %28 : vector<16x1xi1> to vector<16x1xi32>
    %30 = vector.shape_cast %29 : vector<16x1xi32> to vector<1x16x1xi32>
    %cst_7 = arith.constant dense<0> : vector<1xi32>
    %31 = vector.multi_reduction <add>, %30, %cst_7 [1, 2] : vector<1x16x1xi32> to vector<1xi32>
    %32 = vector.shape_cast %31 : vector<1xi32> to vector<1x1x1xi32>
    %33 = vector.extract %32[0, 0, 0] : i32 from vector<1x1x1xi32>
    %34 = vector.broadcast %33 : i32 to vector<1x1xi32>
    %35 = tpu.iota {dimensions = array<i32: 1>} : vector<8x128xi32>
    %c0_i32 = arith.constant 0 : i32
    %36 = vector.broadcast %c0_i32 : i32 to vector<8x128xi32>
    %37 = arith.cmpi eq, %35, %36 : vector<8x128xi32>
    %c0_i32_8 = arith.constant 0 : i32
    %38 = vector.shape_cast %25 : vector<1x1xi32> to vector<1x1xi32>
    %39 = vector.broadcast %38 : vector<1x1xi32> to vector<8x128xi32>
    %40 = vector.broadcast %c0_i32_8 : i32 to vector<8x128xi32>
    %41 = arith.select %37, %39, %40 : vector<8x128xi1>, vector<8x128xi32>
    %c1_i32 = arith.constant 1 : i32
    %42 = vector.broadcast %c1_i32 : i32 to vector<8x128xi32>
    %43 = arith.cmpi eq, %35, %42 : vector<8x128xi32>
    %c0_i32_9 = arith.constant 0 : i32
    %44 = vector.shape_cast %34 : vector<1x1xi32> to vector<1x1xi32>
    %45 = vector.broadcast %44 : vector<1x1xi32> to vector<8x128xi32>
    %46 = vector.broadcast %c0_i32_9 : i32 to vector<8x128xi32>
    %47 = arith.select %43, %45, %46 : vector<8x128xi1>, vector<8x128xi32>
    %48 = arith.addi %41, %47 : vector<8x128xi32>
    %c0_10 = arith.constant 0 : index
    %c0_11 = arith.constant 0 : index
    %c0_12 = arith.constant 0 : index
    %49 = vector.load %arg4[%c0_10, %c0_11, %c0_12] : memref<1x8x128xi32, #tpu.memory_space<vmem>>, vector<1x8x128xi32>
    %50 = vector.shape_cast %49 : vector<1x8x128xi32> to vector<8x128xi32>
    %51 = vector.shape_cast %48 : vector<8x128xi32> to vector<1x8x128xi32>
    tpu.vector_store %arg4[%c0_10, %c0_11, %c0_12], %51 {strides = array<i32>} : memref<1x8x128xi32, #tpu.memory_space<vmem>>, vector<1x8x128xi32>,
    return
  }
  func.func @transform_0(%arg0: i32, %arg1: memref<1xi32, #tpu.memory_space<smem>>) -> (i32, i32) {
    %c0_i32 = arith.constant 0 : i32
    %c0_i32_0 = arith.constant 0 : i32
    return %arg0, %c0_i32 : i32, i32
  }
  func.func @transform_1(%arg0: i32, %arg1: memref<1xi32, #tpu.memory_space<smem>>) -> (i32, i32) {
    %c0_i32 = arith.constant 0 : i32
    %c0_i32_0 = arith.constant 0 : i32
    return %arg0, %c0_i32 : i32, i32
  }
  func.func @transform_2(%arg0: i32, %arg1: memref<1xi32, #tpu.memory_space<smem>>) -> (i32, i32, i32) {
    %c0_i32 = arith.constant 0 : i32
    %c0_i32_0 = arith.constant 0 : i32
    %c0_i32_1 = arith.constant 0 : i32
    return %arg0, %c0_i32, %c0_i32_0 : i32, i32, i32
  }
}

</mosaic_0001>

<bundles_post_ra>
// kernel: accuracy_metric.1
= control target key start
LH: loop header
LB: loop body
LE: loop exit
PB: predicated region body
PF: predicated region fallthrough
CT: control target
= control target key end

     0   :  { %vm19_vm0 = vcmask 261120   ;;  %v28_v5 = vlaneseq  ;;  %vm82_vm7 = vcmask 7168   ;;  %v155_v32 = vmov 0   ;;  %s205_s1 = inlined_call_operand.vmem [shape: bf16[16,32], index: 1, kind: input, shape index: {}]   ;;  %s206_s0 = inlined_call_operand.<no memory space> [shape: s32[1], index: 0, kind: input, shape index: {}]   ;;  %s207_s2 = inlined_call_operand.vmem [shape: s32[16,1], index: 2, kind: input, shape index: {}]   ;;  %s208_s3 = inlined_call_operand.vmem [shape: s32[1,8,128], index: 3, kind: output, shape index: {}]  }
   0x1   :  { %v147_v0 = vld [vmem:[%s205_s1] sm:$0xff]   ;;  %v105_v29 = vstv %s206_s0  ;;  %v16_v31 = vld [vmem:[%s207_s2 + $0x8] sm:$0xff] }
   0x2   :  { %v148_v1 = vunpack.c.l.bf16 %v147_v0  ;;  %v149_v3 = vunpack.c.h.bf16 %v147_v0  ;;  %v181_v8 = vand.u32 127, %v28_v5  ;;  %v15_v30 = vld [vmem:[%s207_s2] sm:$0xff]  ;;  %vm107_vm6 = vcmp.ne.s32.totalorder %v16_v31, %v105_v29 }
   0x3   :  { %vm106_vm5 = vcmp.ne.s32.totalorder %v15_v30, %v105_v29  ;;  %v111_v34 = vsel %vm107_vm6, 1, %v155_v32 }
   0x4   :  { %v20_v2 = vsel %vm19_vm0, %v148_v1, -inf  ;;  %v23_v4 = vsel %vm19_vm0, %v149_v3, -inf  ;;  %v110_v33 = vsel %vm106_vm5, 1, %v155_v32  ;;  %v113_v36 = vsel %vm82_vm7, %v111_v34, 0 }
   0x5   :  { %21 = vmax.xlane.f32.xlu0 %v20_v2  ;;  %v112_v35 = vsel %vm82_vm7, %v110_v33, 0  ;;  %vm134_vm10 = vcmp.eq.s32.totalorder %v181_v8, 0  ;;  %vm137_vm11 = vcmp.eq.s32.totalorder %v181_v8, 1 }
   0x6   :  { %v114_v37 = vadd.s32 %v113_v36, %v112_v35 }
   0x8   :  { %v116_v38 = vshrl.u32 %v114_v37, 16  ;;  %v115_v59 = vand.u32 65535, %v114_v37 }
   0xa   :  { %v118_v39 = vcvt.s32.f32 %v116_v38  ;;  %v117_v60 = vcvt.s32.f32 %v115_v59 }
   0xd   :  { %24 = vmax.xlane.f32.xlu0 %v23_v4 }
  0x78   :  { %v22_v6 = vpop.xlane.xlu0 %21 }
  0x79   :  { %v26_v7 = vpack.c.bf16 %v22_v6, %v22_v6 }
  0x7b   :  { %v30_v9 = vunpack.c.l.bf16 %v26_v7 }
  0x7d   :  { %vm32_vm1 = vcmp.eq.f32.partialorder %v148_v1, %v30_v9 }
  0x7e   :  { %v34_v10 = vsel %vm32_vm1, %v181_v8, 32 }
  0x7f   :  { %v36_v11 = vsel %vm19_vm0, %v34_v10, 2147483647 }
  0x80   :  { %v25_v12 = vpop.xlane.xlu0 %24  ;;  %v38_v13 = vshra.s32 %v36_v11, 16  ;;  %v37_v21 = vand.u32 65535, %v36_v11 }
  0x81   :  { %v27_v14 = vpack.c.bf16 %v25_v12, %v25_v12 }
  0x82   :  { %v40_v15 = vcvt.s32.f32 %v38_v13  ;;  %v39_v23 = vcvt.s32.f32 %v37_v21 }
  0x83   :  { %v31_v16 = vunpack.c.l.bf16 %v27_v14 }
  0x84   :  { %41 = vmin.xlane.f32.xlu1 %v40_v15 }
  0x85   :  { %vm33_vm2 = vcmp.eq.f32.partialorder %v149_v3, %v31_v16 }
  0x86   :  { %v35_v17 = vsel %vm33_vm2, %v181_v8, 32 }
  0x87   :  { %v51_v18 = vsel %vm19_vm0, %v35_v17, 2147483647 }
  0x88   :  { %v53_v19 = vshra.s32 %v51_v18, 16  ;;  %v52_v25 = vand.u32 65535, %v51_v18 }
  0x8a   :  { %v55_v20 = vcvt.s32.f32 %v53_v19  ;;  %v54_v27 = vcvt.s32.f32 %v52_v25 }
  0x8c   :  { %56 = vmin.xlane.f32.xlu1 %v55_v20 }
  0x94   :  { %121 = vadd.xlane.f32.xlu1 %v118_v39 }
  0xf7   :  { %v42_v22 = vpop.xlane.xlu1 %41 }
  0xf8   :  { %vm43_vm3 = vcmp.eq.f32.partialorder %v40_v15, %v42_v22  ;;  %v48_v40 = vcvt.f32.s32 %v42_v22 }
  0xf9   :  { %v44_v24 = vsel %vm43_vm3, %v39_v23, inf }
  0xfa   :  { %45 = vmin.xlane.f32.xlu2 %v44_v24  ;;  %v49_v43 = vshll.u32 %v48_v40, 16 }
  0xff   :  { %v57_v26 = vpop.xlane.xlu1 %56 }
 0x100   :  { %vm58_vm4 = vcmp.eq.f32.partialorder %v55_v20, %v57_v26  ;;  %v63_v44 = vcvt.f32.s32 %v57_v26 }
 0x101   :  { %v59_v28 = vsel %vm58_vm4, %v54_v27, inf }
 0x102   :  { %60 = vmin.xlane.f32.xlu2 %v59_v28  ;;  %v64_v47 = vshll.u32 %v63_v44, 16 }
 0x107   :  { %v122_v61 = vpop.xlane.xlu1 %121 }
 0x108   :  { %v124_v3 = vcvt.f32.s32 %v122_v61 }
 0x10a   :  { %v125_v6 = vshll.u32 %v124_v3, 16 }
 0x16d   :  { %v46_v41 = vpop.xlane.xlu2 %45 }
 0x16e   :  { %v47_v42 = vcvt.f32.s32 %v46_v41 }
 0x170   :  { %v50_v45 = vadd.s32 %v49_v43, %v47_v42 }
 0x172   :  { %vm76_vm8 = vcmp.eq.s32.totalorder %v50_v45, %v15_v30 }
 0x173   :  { %v80_v50 = vsel %vm76_vm8, 1, %v155_v32 }
 0x174   :  { %v83_v52 = vsel %vm82_vm7, %v80_v50, 0 }
 0x175   :  { %v61_v46 = vpop.xlane.xlu2 %60 }
 0x176   :  { %v62_v48 = vcvt.f32.s32 %v61_v46 }
 0x178   :  { %v65_v49 = vadd.s32 %v64_v47, %v62_v48 }
 0x17a   :  { %vm77_vm9 = vcmp.eq.s32.totalorder %v65_v49, %v16_v31 }
 0x17b   :  { %v81_v51 = vsel %vm77_vm9, 1, %v155_v32 }
 0x17c   :  { %v84_v53 = vsel %vm82_vm7, %v81_v51, 0 }
 0x17d   :  { %v85_v54 = vadd.s32 %v84_v53, %v83_v52 }
 0x17f   :  { %v87_v55 = vshrl.u32 %v85_v54, 16  ;;  %v86_v56 = vand.u32 65535, %v85_v54 }
 0x181   :  { %v89_v57 = vcvt.s32.f32 %v87_v55  ;;  %v88_v58 = vcvt.s32.f32 %v86_v56 }
 0x183   :  { %92 = vadd.xlane.f32.xlu0 %v89_v57  ;;  %90 = vadd.xlane.f32.xlu2 %v88_v58 }
 0x18b   :  { %119 = vadd.xlane.f32.xlu0 %v117_v60 }
 0x1f6   :  { %v93_v62 = vpop.xlane.xlu0 %92  ;;  %v91_v63 = vpop.xlane.xlu2 %90 }
 0x1f7   :  { %v95_v0 = vcvt.f32.s32 %v93_v62  ;;  %v94_v2 = vcvt.f32.s32 %v91_v63 }
 0x1f9   :  { %v96_v1 = vshll.u32 %v95_v0, 16 }
 0x1fb   :  { %v97_v4 = vadd.s32 %v96_v1, %v94_v2 }
 0x1fd   :  { %v98_v5 = vrot.slane %v97_v4, 4 }
 0x1fe   :  { %v120_v7 = vpop.xlane.xlu0 %119 }
 0x1ff   :  { %v99_v9 = vadd.s32 %v98_v5, %v97_v4  ;;  %v123_v10 = vcvt.f32.s32 %v120_v7 }
 0x201   :  { %v126_v11 = vadd.s32 %v125_v6, %v123_v10  ;;  %v100_v12 = vrot.slane %v99_v9, 2 }
 0x203   :  { %v127_v13 = vrot.slane %v126_v11, 4  ;;  %v101_v14 = vadd.s32 %v100_v12, %v99_v9 }
 0x205   :  { %v128_v15 = vadd.s32 %v127_v13, %v126_v11  ;;  %v102_v16 = vrot.slane %v101_v14, 1 }
 0x207   :  { %v103_v17 = vadd.s32 %v102_v16, %v101_v14  ;;  %v129_v18 = vrot.slane %v128_v15, 2 }
 0x209   :  { %150 = vpush %v103_v17  ;;  %v130_v19 = vadd.s32 %v129_v18, %v128_v15 }
 0x20b   :  { %v131_v20 = vrot.slane %v130_v19, 1 }
 0x20d   :  { %v132_v21 = vadd.s32 %v131_v20, %v130_v19 }
 0x20f   :  { %152 = vpush %v132_v21 }
 0x23a   :  { %s151_s0 = spop %150 }
 0x23b   :  { %v135_v22 = vstv %s151_s0 }
 0x23c   :  { %v136_v24 = vsel %vm134_vm10, %v135_v22, 0 }
 0x240   :  { %s153_s2 = spop %152 }
 0x241   :  { %v138_v23 = vstv %s153_s2 }
 0x242   :  { %v139_v25 = vsel %vm137_vm11, %v138_v23, 0 }
 0x243   :  { %v140_v26 = vadd.s32 %v139_v25, %v136_v24 }
 0x245   :  { %141 = vst [vmem:[%s208_s3] sm:$0xff] %v140_v26 }

</bundles_post_ra>
